<compile_context>
chip_gen: v7x
topology: tpu7x:2x2x1
jax: 0.10.0
libtpu: 0.0.40
codegen_flags: <defaults>
</compile_context>

<pallas_src>
import functools
import math

import jax
import jax.numpy as jnp
from jax.experimental import pallas as pl
from jax.experimental.pallas import tpu as pltpu

_LANES = 128


# ---------------------------------------------------------------------------
# Kernels
# ---------------------------------------------------------------------------
def _ln_scaling_kernel(x_ref, o_ref, *, eps, scale, inv_h):
    """One (tile_rows, H) tile; reduction over the lane axis."""
    x = x_ref[...].astype(jnp.float32)
    mean = jnp.sum(x, axis=-1, keepdims=True) * inv_h
    xc = x - mean
    var = jnp.sum(xc * xc, axis=-1, keepdims=True) * inv_h  # unbiased=False
    # Fold the 1/sqrt(depth) scale into the (rows, 1) rsqrt column (EUP slot):
    # one narrow multiply instead of an extra full-tile multiply.
    inv = jax.lax.rsqrt(var + eps) * scale
    o_ref[...] = (xc * inv).astype(o_ref.dtype)


def _ln_scaling_packed_kernel(x_ref, o_ref, *, eps, scale, inv_h, h, g):
    """Lane-packed tile: each 128-wide row holds `g` independent rows of width h.

    Keeps the output store lane-dense (no masked vst) when H < 128.  The
    per-group reduction uses g masked full-width reductions: exact f32 math
    and pure VPU/XLU work, free filler for this HBM-bound kernel (g <= 16).
    """
    x = x_ref[...].astype(jnp.float32)
    lane = jax.lax.broadcasted_iota(jnp.int32, x.shape, 1)
    mean = jnp.zeros_like(x)
    for grp in range(g):
        m = (lane >= grp * h) & (lane < (grp + 1) * h)
        s = jnp.sum(jnp.where(m, x, 0.0), axis=-1, keepdims=True) * inv_h
        mean = jnp.where(m, s, mean)
    xc = x - mean
    sq = xc * xc
    var = jnp.zeros_like(x)
    for grp in range(g):
        m = (lane >= grp * h) & (lane < (grp + 1) * h)
        v = jnp.sum(jnp.where(m, sq, 0.0), axis=-1, keepdims=True) * inv_h
        var = jnp.where(m, v, var)
    inv = jax.lax.rsqrt(var + eps) * scale
    o_ref[...] = (xc * inv).astype(o_ref.dtype)


def _ln_stats_kernel(x_ref, mean_ref, inv_ref, sum_sc, sq_sc,
                     *, eps, scale, inv_h, h, tile_h):
    """Pass 1 of the huge-H path: accumulate per-row sum / sumsq over H chunks."""
    j = pl.program_id(1)

    @pl.when(j == 0)
    def _():
        sum_sc[...] = jnp.zeros_like(sum_sc)
        sq_sc[...] = jnp.zeros_like(sq_sc)

    x = x_ref[...].astype(jnp.float32)
    # Mask the padded tail columns of the final (boundary) H chunk.
    col = j * tile_h + jax.lax.broadcasted_iota(jnp.int32, x.shape, 1)
    x = jnp.where(col < h, x, 0.0)
    sum_sc[...] += jnp.sum(x, axis=-1, keepdims=True)
    sq_sc[...] += jnp.sum(x * x, axis=-1, keepdims=True)

    @pl.when(j == pl.num_programs(1) - 1)
    def _():
        mean = sum_sc[...] * inv_h
        # E[x^2] - mean^2 in f32 (clamped): one stats read of x instead of two.
        var = jnp.maximum(sq_sc[...] * inv_h - mean * mean, 0.0)
        mean_ref[...] = mean
        inv_ref[...] = jax.lax.rsqrt(var + eps) * scale


def _ln_apply_kernel(x_ref, mean_ref, inv_ref, o_ref):
    """Pass 2 of the huge-H path: normalize one (tile_rows, tile_h) chunk."""
    x = x_ref[...].astype(jnp.float32)
    o_ref[...] = ((x - mean_ref[...]) * inv_ref[...]).astype(o_ref.dtype)


# ---------------------------------------------------------------------------
# Tiling helpers
# ---------------------------------------------------------------------------
def _sublane_multiple(dtype):
    itemsize = jnp.dtype(dtype).itemsize
    return {4: 8, 2: 16, 1: 32}.get(itemsize, 8)


def _vmem_capacity_bytes():
    try:
        cap = getattr(pltpu.get_tpu_info(), "vmem_capacity_bytes", None)
    except Exception:
        cap = None
    return int(cap) if cap else 64 * 1024 * 1024  # conservative: v7x physical VMEM


def _vmem_limit_bytes(cap):
    # ~25% headroom for compiler scratch; never request more than 100 MiB.
    return int(min(cap * 3 // 4, 100 * 1024 * 1024))


def _row_cap(h_lane, vmem_cap):
    # Chip-aware: bigger DMA bursts on the 128 MiB-VMEM chips (v5e/v6e) for
    # narrow rows; ~1024 on v7x (64 MiB) where the VMEM budget binds anyway.
    if vmem_cap >= 96 * 1024 * 1024:
        if h_lane <= 512:
            return 4096
        if h_lane <= 1024:
            return 2048
    return 1024


def _max_tile_rows(h_lane, dtype, vmem_budget, row_cap):
    """Largest sublane-aligned row tile fitting the budget; 0 => chunked-H path."""
    itemsize = jnp.dtype(dtype).itemsize
    # Double-buffered in + out tiles in the I/O dtype, plus ~3 f32 temporaries.
    bytes_per_row = h_lane * (4 * itemsize + 3 * 4)
    sublane = _sublane_multiple(dtype)
    max_rows = (vmem_budget // max(1, bytes_per_row)) // sublane * sublane
    if max_rows < sublane:
        return 0
    return int(min(row_cap, max_rows))


def _pick_tile_rows(rows, max_tile, sublane, *, min_steps=8, min_tile_rows=512):
    """Row tile for a cdiv grid: as large as the budget allows, shrunk (not
    below ~min_tile_rows) until the grid has >= min_steps steps so the
    double-buffer pipeline overlaps and both v7x TensorCores get several
    blocks of the "parallel" row axis."""
    if rows <= sublane:
        return rows  # single full-extent block is always a legal block shape
    down = lambda v: max(sublane, (v // sublane) * sublane)
    tile = down(min(max_tile, rows))
    floor_tile = min(tile, down(min_tile_rows))
    while tile > floor_tile and pl.cdiv(rows, tile) < min_steps:
        tile = max(floor_tile, down(tile // 2))
    return tile


# ---------------------------------------------------------------------------
# Wrappers
# ---------------------------------------------------------------------------
def _layer_norm_scaling_chunked(x2, *, eps, scale, tile_rows=None, tile_h=None):
    """Two-pass (stats + normalize) path for rows too wide to hold in VMEM."""
    rows, H = x2.shape
    dtype = x2.dtype
    sublane = _sublane_multiple(dtype)
    itemsize = jnp.dtype(dtype).itemsize
    vmem_cap = _vmem_capacity_bytes()
    vmem_limit = _vmem_limit_bytes(vmem_cap)
    budget = int(vmem_limit * 0.8)

    if tile_rows is None:
        tile_rows = rows if rows <= sublane else min((rows // sublane) * sublane,
                                                     32 * sublane)
    if H <= _LANES:
        tile_h = H
    else:
        if tile_h is None:
            per_col = tile_rows * (4 * itemsize + 4)
            tile_h = max(_LANES, (budget // max(1, per_col)) // _LANES * _LANES)
        tile_h = min(tile_h, pl.cdiv(H, _LANES) * _LANES)

    grid = (pl.cdiv(rows, tile_rows), pl.cdiv(H, tile_h))
    inv_h = 1.0 / H

    stats_kernel = functools.partial(
        _ln_stats_kernel, eps=eps, scale=scale, inv_h=inv_h, h=H, tile_h=tile_h)

    mean, inv = pl.pallas_call(
        stats_kernel,
        out_shape=(jax.ShapeDtypeStruct((rows, 1), jnp.float32),
                   jax.ShapeDtypeStruct((rows, 1), jnp.float32)),
        grid_spec=pltpu.PrefetchScalarGridSpec(
            num_scalar_prefetch=0,
            grid=grid,
            in_specs=[pl.BlockSpec((tile_rows, tile_h), lambda i, j: (i, j))],
            out_specs=(pl.BlockSpec((tile_rows, 1), lambda i, j: (i, 0)),
                       pl.BlockSpec((tile_rows, 1), lambda i, j: (i, 0))),
            scratch_shapes=[pltpu.VMEM((tile_rows, 1), jnp.float32),
                            pltpu.VMEM((tile_rows, 1), jnp.float32)],
        ),
        compiler_params=pltpu.CompilerParams(
            dimension_semantics=("parallel", "arbitrary"),
            vmem_limit_bytes=vmem_limit,
        ),
    )(x2)

    out2 = pl.pallas_call(
        _ln_apply_kernel,
        out_shape=jax.ShapeDtypeStruct((rows, H), dtype),
        grid_spec=pltpu.PrefetchScalarGridSpec(
            num_scalar_prefetch=0,
            grid=grid,
            in_specs=[pl.BlockSpec((tile_rows, tile_h), lambda i, j: (i, j)),
                      pl.BlockSpec((tile_rows, 1), lambda i, j: (i, 0)),
                      pl.BlockSpec((tile_rows, 1), lambda i, j: (i, 0))],
            out_specs=pl.BlockSpec((tile_rows, tile_h), lambda i, j: (i, j)),
        ),
        compiler_params=pltpu.CompilerParams(
            dimension_semantics=("parallel", "arbitrary"),
            vmem_limit_bytes=vmem_limit,
        ),
    )(x2, mean, inv)
    return out2


def layer_norm_scaling(x, depth, eps=1e-5, tile_rows=None):
    """LayerNorm over the last axis, scaled by 1/sqrt(depth).  x: [..., H]."""
    depth = max(1, int(depth))
    scale = 1.0 / math.sqrt(depth)
    eps = float(eps)

    orig_shape = x.shape
    H = orig_shape[-1]
    rows = int(math.prod(orig_shape[:-1]))
    x2 = x.reshape(rows, H)

    sublane = _sublane_multiple(x.dtype)
    vmem_cap = _vmem_capacity_bytes()
    vmem_limit = _vmem_limit_bytes(vmem_cap)
    tile_budget = int(vmem_limit * 0.8)

    # ---- H < 128: pack G = 128 // H rows into one lane-dense 128-wide row.
    # [rows, H] -> [rows // G, G*H] is a free (contiguous) reshape; stores
    # become unmasked full-lane vst instead of masked partial stores.
    g = 1
    if H < _LANES and _LANES % H == 0 and H >= 8:
        g_cand = _LANES // H
        if rows % g_cand == 0:
            g = g_cand
    rows_k, h_lane = rows // g, H * g
    x2 = x2.reshape(rows_k, h_lane)

    row_cap = _row_cap(h_lane, vmem_cap)
    max_tile = _max_tile_rows(h_lane, x.dtype, tile_budget, row_cap)

    if max_tile == 0:
        # Huge H: even a sublane-high row block exceeds the VMEM budget
        # (hit first on v7x's 64 MiB).  Two-pass H-chunked path.
        out2 = _layer_norm_scaling_chunked(x.reshape(rows, H), eps=eps, scale=scale)
        return out2.reshape(orig_shape)

    if tile_rows is not None:
        # Clamp a user-supplied tile to the VMEM budget / sublane alignment.
        tile_rows = max(sublane, min(int(tile_rows), max_tile))
        tile_rows = (tile_rows // sublane) * sublane
        if rows_k <= sublane:
            tile_rows = rows_k
        else:
            tile_rows = min(tile_rows, (rows_k // sublane) * sublane)
    else:
        tile_rows = _pick_tile_rows(rows_k, max_tile, sublane)

    if g > 1:
        kernel = functools.partial(_ln_scaling_packed_kernel, eps=eps, scale=scale,
                                   inv_h=1.0 / H, h=H, g=g)
    else:
        kernel = functools.partial(_ln_scaling_kernel, eps=eps, scale=scale,
                                   inv_h=1.0 / H)

    out2 = pl.pallas_call(
        kernel,
        out_shape=jax.ShapeDtypeStruct((rows_k, h_lane), x.dtype),
        grid_spec=pltpu.PrefetchScalarGridSpec(
            num_scalar_prefetch=0,
            # cdiv grid: the last partial row block is boundary-masked; rows
            # are independent so padded rows never reach the real output.
            grid=(pl.cdiv(rows_k, tile_rows),),
            in_specs=[pl.BlockSpec((tile_rows, h_lane), lambda i: (i, 0))],
            out_specs=pl.BlockSpec((tile_rows, h_lane), lambda i: (i, 0)),
        ),
        compiler_params=pltpu.CompilerParams(
            # Row blocks are independent; on v7x the two TensorCores split this
            # axis.  TODO(synk): verify the megacore split in an xprof trace and
            # switch this axis to pltpu.CORE_PARALLEL if one core sits idle.
            dimension_semantics=("parallel",),
            vmem_limit_bytes=vmem_limit,
        ),
    )(x2)

    return out2.reshape(orig_shape)


if __name__ == "__main__":
    depth = 4
    eps = 1e-5
    scale = 1.0 / math.sqrt(max(1, depth))

    # Shape implied by the module's forward: [batch_size, seq_len, hidden_dim].
    B, S, H = 2, 8, 32
    x = jax.random.normal(jax.random.PRNGKey(0), (B, S, H), dtype=jnp.float32)

    out = layer_norm_scaling(x, depth=depth, eps=eps)
    out = jax.block_until_ready(out)

    # Reference (mirrors the PyTorch forward exactly).
    mean = jnp.mean(x, axis=-1, keepdims=True)
    var = jnp.mean((x - mean) ** 2, axis=-1, keepdims=True)
    ref = (x - mean) / jnp.sqrt(var + eps) * scale

    assert out.shape == (B, S, H)
    assert out.dtype == x.dtype
    assert jnp.allclose(out, ref, atol=1e-5, rtol=1e-5)

    # Exercise the huge-H two-pass fallback on a small shape with forced tiny
    # tiles and a ragged H (covers the chunk-tail masking and accumulation).
    B2, S2, H2 = 2, 8, 200
    xb = jax.random.normal(jax.random.PRNGKey(1), (B2, S2, H2), dtype=jnp.float32)
    out_c = _layer_norm_scaling_chunked(
        xb.reshape(B2 * S2, H2), eps=eps, scale=scale, tile_rows=8, tile_h=128)
    out_c = jax.block_until_ready(out_c).reshape(B2, S2, H2)

    mean2 = jnp.mean(xb, axis=-1, keepdims=True)
    var2 = jnp.mean((xb - mean2) ** 2, axis=-1, keepdims=True)
    ref2 = (xb - mean2) / jnp.sqrt(var2 + eps) * scale
    assert jnp.allclose(out_c, ref2, atol=1e-4, rtol=1e-4)

    print("KERNEL_OK")
</pallas_src>

<mosaic_0001>
module attributes {stable_mosaic.version = 11 : i64} {
  func.func @_ln_scaling_packed_kernel(%arg0: i32, %arg1: memref<4x128xf32, #tpu.memory_space<vmem>>, %arg2: memref<4x128xf32, #tpu.memory_space<vmem>>) attributes {dimension_semantics = [#tpu.dimension_semantics<parallel>], iteration_bounds = array<i64: 1>, scalar_prefetch = 0 : i64, scratch_operands = 0 : i64, tpu.core_type = #tpu.core_type<tc>, window_params = [{transform_indices = @transform_0, window_bounds = array<i64: 4, 128>}, {transform_indices = @transform_1, window_bounds = array<i64: 4, 128>}]} {
    %c0 = arith.constant 0 : index
    %c0_0 = arith.constant 0 : index
    %0 = vector.load %arg1[%c0, %c0_0] : memref<4x128xf32, #tpu.memory_space<vmem>>, vector<4x128xf32>
    %1 = tpu.iota {dimensions = array<i32: 1>} : vector<4x128xi32>
    %cst = arith.constant 0.000000e+00 : f32
    %2 = vector.broadcast %cst : f32 to vector<4x128xf32>
    %c0_i32 = arith.constant 0 : i32
    %3 = vector.broadcast %c0_i32 : i32 to vector<4x128xi32>
    %4 = arith.cmpi sge, %1, %3 : vector<4x128xi32>
    %c32_i32 = arith.constant 32 : i32
    %5 = vector.broadcast %c32_i32 : i32 to vector<4x128xi32>
    %6 = arith.cmpi slt, %1, %5 : vector<4x128xi32>
    %7 = arith.andi %4, %6 : vector<4x128xi1>
    %cst_1 = arith.constant 0.000000e+00 : f32
    %8 = vector.broadcast %cst_1 : f32 to vector<4x128xf32>
    %9 = arith.select %7, %0, %8 : vector<4x128xi1>, vector<4x128xf32>
    %cst_2 = arith.constant dense<0.000000e+00> : vector<4xf32>
    %10 = vector.multi_reduction <add>, %9, %cst_2 [1] : vector<4x128xf32> to vector<4xf32>
    %11 = vector.shape_cast %10 : vector<4xf32> to vector<4x1xf32>
    %cst_3 = arith.constant 3.125000e-02 : f32
    %12 = vector.broadcast %cst_3 : f32 to vector<4x1xf32>
    %13 = arith.mulf %11, %12 : vector<4x1xf32>
    %14 = vector.shape_cast %13 : vector<4x1xf32> to vector<4x1xf32>
    %15 = vector.broadcast %14 : vector<4x1xf32> to vector<4x128xf32>
    %16 = arith.select %7, %15, %2 : vector<4x128xi1>, vector<4x128xf32>
    %c32_i32_4 = arith.constant 32 : i32
    %17 = vector.broadcast %c32_i32_4 : i32 to vector<4x128xi32>
    %18 = arith.cmpi sge, %1, %17 : vector<4x128xi32>
    %c64_i32 = arith.constant 64 : i32
    %19 = vector.broadcast %c64_i32 : i32 to vector<4x128xi32>
    %20 = arith.cmpi slt, %1, %19 : vector<4x128xi32>
    %21 = arith.andi %18, %20 : vector<4x128xi1>
    %cst_5 = arith.constant 0.000000e+00 : f32
    %22 = vector.broadcast %cst_5 : f32 to vector<4x128xf32>
    %23 = arith.select %21, %0, %22 : vector<4x128xi1>, vector<4x128xf32>
    %cst_6 = arith.constant dense<0.000000e+00> : vector<4xf32>
    %24 = vector.multi_reduction <add>, %23, %cst_6 [1] : vector<4x128xf32> to vector<4xf32>
    %25 = vector.shape_cast %24 : vector<4xf32> to vector<4x1xf32>
    %cst_7 = arith.constant 3.125000e-02 : f32
    %26 = vector.broadcast %cst_7 : f32 to vector<4x1xf32>
    %27 = arith.mulf %25, %26 : vector<4x1xf32>
    %28 = vector.shape_cast %27 : vector<4x1xf32> to vector<4x1xf32>
    %29 = vector.broadcast %28 : vector<4x1xf32> to vector<4x128xf32>
    %30 = arith.select %21, %29, %16 : vector<4x128xi1>, vector<4x128xf32>
    %c64_i32_8 = arith.constant 64 : i32
    %31 = vector.broadcast %c64_i32_8 : i32 to vector<4x128xi32>
    %32 = arith.cmpi sge, %1, %31 : vector<4x128xi32>
    %c96_i32 = arith.constant 96 : i32
    %33 = vector.broadcast %c96_i32 : i32 to vector<4x128xi32>
    %34 = arith.cmpi slt, %1, %33 : vector<4x128xi32>
    %35 = arith.andi %32, %34 : vector<4x128xi1>
    %cst_9 = arith.constant 0.000000e+00 : f32
    %36 = vector.broadcast %cst_9 : f32 to vector<4x128xf32>
    %37 = arith.select %35, %0, %36 : vector<4x128xi1>, vector<4x128xf32>
    %cst_10 = arith.constant dense<0.000000e+00> : vector<4xf32>
    %38 = vector.multi_reduction <add>, %37, %cst_10 [1] : vector<4x128xf32> to vector<4xf32>
    %39 = vector.shape_cast %38 : vector<4xf32> to vector<4x1xf32>
    %cst_11 = arith.constant 3.125000e-02 : f32
    %40 = vector.broadcast %cst_11 : f32 to vector<4x1xf32>
    %41 = arith.mulf %39, %40 : vector<4x1xf32>
    %42 = vector.shape_cast %41 : vector<4x1xf32> to vector<4x1xf32>
    %43 = vector.broadcast %42 : vector<4x1xf32> to vector<4x128xf32>
    %44 = arith.select %35, %43, %30 : vector<4x128xi1>, vector<4x128xf32>
    %c96_i32_12 = arith.constant 96 : i32
    %45 = vector.broadcast %c96_i32_12 : i32 to vector<4x128xi32>
    %46 = arith.cmpi sge, %1, %45 : vector<4x128xi32>
    %c128_i32 = arith.constant 128 : i32
    %47 = vector.broadcast %c128_i32 : i32 to vector<4x128xi32>
    %48 = arith.cmpi slt, %1, %47 : vector<4x128xi32>
    %49 = arith.andi %46, %48 : vector<4x128xi1>
    %cst_13 = arith.constant 0.000000e+00 : f32
    %50 = vector.broadcast %cst_13 : f32 to vector<4x128xf32>
    %51 = arith.select %49, %0, %50 : vector<4x128xi1>, vector<4x128xf32>
    %cst_14 = arith.constant dense<0.000000e+00> : vector<4xf32>
    %52 = vector.multi_reduction <add>, %51, %cst_14 [1] : vector<4x128xf32> to vector<4xf32>
    %53 = vector.shape_cast %52 : vector<4xf32> to vector<4x1xf32>
    %cst_15 = arith.constant 3.125000e-02 : f32
    %54 = vector.broadcast %cst_15 : f32 to vector<4x1xf32>
    %55 = arith.mulf %53, %54 : vector<4x1xf32>
    %56 = vector.shape_cast %55 : vector<4x1xf32> to vector<4x1xf32>
    %57 = vector.broadcast %56 : vector<4x1xf32> to vector<4x128xf32>
    %58 = arith.select %49, %57, %44 : vector<4x128xi1>, vector<4x128xf32>
    %59 = arith.subf %0, %58 : vector<4x128xf32>
    %60 = arith.mulf %59, %59 : vector<4x128xf32>
    %cst_16 = arith.constant 0.000000e+00 : f32
    %61 = vector.broadcast %cst_16 : f32 to vector<4x128xf32>
    %c0_i32_17 = arith.constant 0 : i32
    %62 = vector.broadcast %c0_i32_17 : i32 to vector<4x128xi32>
    %63 = arith.cmpi sge, %1, %62 : vector<4x128xi32>
    %c32_i32_18 = arith.constant 32 : i32
    %64 = vector.broadcast %c32_i32_18 : i32 to vector<4x128xi32>
    %65 = arith.cmpi slt, %1, %64 : vector<4x128xi32>
    %66 = arith.andi %63, %65 : vector<4x128xi1>
    %cst_19 = arith.constant 0.000000e+00 : f32
    %67 = vector.broadcast %cst_19 : f32 to vector<4x128xf32>
    %68 = arith.select %66, %60, %67 : vector<4x128xi1>, vector<4x128xf32>
    %cst_20 = arith.constant dense<0.000000e+00> : vector<4xf32>
    %69 = vector.multi_reduction <add>, %68, %cst_20 [1] : vector<4x128xf32> to vector<4xf32>
    %70 = vector.shape_cast %69 : vector<4xf32> to vector<4x1xf32>
    %cst_21 = arith.constant 3.125000e-02 : f32
    %71 = vector.broadcast %cst_21 : f32 to vector<4x1xf32>
    %72 = arith.mulf %70, %71 : vector<4x1xf32>
    %73 = vector.shape_cast %72 : vector<4x1xf32> to vector<4x1xf32>
    %74 = vector.broadcast %73 : vector<4x1xf32> to vector<4x128xf32>
    %75 = arith.select %66, %74, %61 : vector<4x128xi1>, vector<4x128xf32>
    %c32_i32_22 = arith.constant 32 : i32
    %76 = vector.broadcast %c32_i32_22 : i32 to vector<4x128xi32>
    %77 = arith.cmpi sge, %1, %76 : vector<4x128xi32>
    %c64_i32_23 = arith.constant 64 : i32
    %78 = vector.broadcast %c64_i32_23 : i32 to vector<4x128xi32>
    %79 = arith.cmpi slt, %1, %78 : vector<4x128xi32>
    %80 = arith.andi %77, %79 : vector<4x128xi1>
    %cst_24 = arith.constant 0.000000e+00 : f32
    %81 = vector.broadcast %cst_24 : f32 to vector<4x128xf32>
    %82 = arith.select %80, %60, %81 : vector<4x128xi1>, vector<4x128xf32>
    %cst_25 = arith.constant dense<0.000000e+00> : vector<4xf32>
    %83 = vector.multi_reduction <add>, %82, %cst_25 [1] : vector<4x128xf32> to vector<4xf32>
    %84 = vector.shape_cast %83 : vector<4xf32> to vector<4x1xf32>
    %cst_26 = arith.constant 3.125000e-02 : f32
    %85 = vector.broadcast %cst_26 : f32 to vector<4x1xf32>
    %86 = arith.mulf %84, %85 : vector<4x1xf32>
    %87 = vector.shape_cast %86 : vector<4x1xf32> to vector<4x1xf32>
    %88 = vector.broadcast %87 : vector<4x1xf32> to vector<4x128xf32>
    %89 = arith.select %80, %88, %75 : vector<4x128xi1>, vector<4x128xf32>
    %c64_i32_27 = arith.constant 64 : i32
    %90 = vector.broadcast %c64_i32_27 : i32 to vector<4x128xi32>
    %91 = arith.cmpi sge, %1, %90 : vector<4x128xi32>
    %c96_i32_28 = arith.constant 96 : i32
    %92 = vector.broadcast %c96_i32_28 : i32 to vector<4x128xi32>
    %93 = arith.cmpi slt, %1, %92 : vector<4x128xi32>
    %94 = arith.andi %91, %93 : vector<4x128xi1>
    %cst_29 = arith.constant 0.000000e+00 : f32
    %95 = vector.broadcast %cst_29 : f32 to vector<4x128xf32>
    %96 = arith.select %94, %60, %95 : vector<4x128xi1>, vector<4x128xf32>
    %cst_30 = arith.constant dense<0.000000e+00> : vector<4xf32>
    %97 = vector.multi_reduction <add>, %96, %cst_30 [1] : vector<4x128xf32> to vector<4xf32>
    %98 = vector.shape_cast %97 : vector<4xf32> to vector<4x1xf32>
    %cst_31 = arith.constant 3.125000e-02 : f32
    %99 = vector.broadcast %cst_31 : f32 to vector<4x1xf32>
    %100 = arith.mulf %98, %99 : vector<4x1xf32>
    %101 = vector.shape_cast %100 : vector<4x1xf32> to vector<4x1xf32>
    %102 = vector.broadcast %101 : vector<4x1xf32> to vector<4x128xf32>
    %103 = arith.select %94, %102, %89 : vector<4x128xi1>, vector<4x128xf32>
    %c96_i32_32 = arith.constant 96 : i32
    %104 = vector.broadcast %c96_i32_32 : i32 to vector<4x128xi32>
    %105 = arith.cmpi sge, %1, %104 : vector<4x128xi32>
    %c128_i32_33 = arith.constant 128 : i32
    %106 = vector.broadcast %c128_i32_33 : i32 to vector<4x128xi32>
    %107 = arith.cmpi slt, %1, %106 : vector<4x128xi32>
    %108 = arith.andi %105, %107 : vector<4x128xi1>
    %cst_34 = arith.constant 0.000000e+00 : f32
    %109 = vector.broadcast %cst_34 : f32 to vector<4x128xf32>
    %110 = arith.select %108, %60, %109 : vector<4x128xi1>, vector<4x128xf32>
    %cst_35 = arith.constant dense<0.000000e+00> : vector<4xf32>
    %111 = vector.multi_reduction <add>, %110, %cst_35 [1] : vector<4x128xf32> to vector<4xf32>
    %112 = vector.shape_cast %111 : vector<4xf32> to vector<4x1xf32>
    %cst_36 = arith.constant 3.125000e-02 : f32
    %113 = vector.broadcast %cst_36 : f32 to vector<4x1xf32>
    %114 = arith.mulf %112, %113 : vector<4x1xf32>
    %115 = vector.shape_cast %114 : vector<4x1xf32> to vector<4x1xf32>
    %116 = vector.broadcast %115 : vector<4x1xf32> to vector<4x128xf32>
    %117 = arith.select %108, %116, %103 : vector<4x128xi1>, vector<4x128xf32>
    %cst_37 = arith.constant 9.99999974E-6 : f32
    %118 = vector.broadcast %cst_37 : f32 to vector<4x128xf32>
    %119 = arith.addf %117, %118 : vector<4x128xf32>
    %120 = math.rsqrt %119 : vector<4x128xf32>
    %cst_38 = arith.constant 5.000000e-01 : f32
    %121 = vector.broadcast %cst_38 : f32 to vector<4x128xf32>
    %122 = arith.mulf %120, %121 : vector<4x128xf32>
    %123 = arith.mulf %59, %122 : vector<4x128xf32>
    %c0_39 = arith.constant 0 : index
    %c0_40 = arith.constant 0 : index
    %124 = vector.load %arg2[%c0_39, %c0_40] : memref<4x128xf32, #tpu.memory_space<vmem>>, vector<4x128xf32>
    tpu.vector_store %arg2[%c0_39, %c0_40], %123 {strides = array<i32>} : memref<4x128xf32, #tpu.memory_space<vmem>>, vector<4x128xf32>,
    return
  }
  func.func @transform_0(%arg0: i32) -> (i32, i32) {
    %c0_i32 = arith.constant 0 : i32
    %c0_i32_0 = arith.constant 0 : i32
    return %arg0, %c0_i32 : i32, i32
  }
  func.func @transform_1(%arg0: i32) -> (i32, i32) {
    %c0_i32 = arith.constant 0 : i32
    %c0_i32_0 = arith.constant 0 : i32
    return %arg0, %c0_i32 : i32, i32
  }
}

</mosaic_0001>

<bundles_post_ra>
// kernel: tpu_custom_call.1
= control target key start
LH: loop header
LB: loop body
LE: loop exit
PB: predicated region body
PF: predicated region fallthrough
CT: control target
= control target key end

     0   :  { %6 = vsyncpa [#allocation3], 0  ;;  %s235_s0 = inlined_call_operand.hbm [shape: f32[4,128], index: 0, kind: input, shape index: {}]   ;;  %s236_s1 = inlined_call_operand.hbm [shape: f32[4,128], index: 1, kind: output, shape index: {}]  }
   0x1   :  { %7 = vsyncpa [#allocation4], 0  ;;  %s159_s6 = smov [#allocation2]   ;;  %s111_s10 = scalar_lea.hbm %s235_s0, 64 }
   0x2   :  { %s14_s7 = sshll.u32 %s159_s6, 4  ;;  %p112_p0 = scmp.ne.s32.totalorder %s235_s0, %s111_s10  ;;  %s15_s7 = int_to_ptr.vmem [resolvable:$true] %s14_s7 }
   0x3   :  { %p115_p1 = scmp.lt.u32.totalorder %s111_s10, %s235_s0 }
   0x5   :  { %p117_p2 = pnand %p115_p1, %p112_p0 }
   0x7   :  { %120 = shalt.err (!%p117_p2)
}
   0x8   :  { %s121_s15 = scalar_lea.vmem %s15_s7, 64  ;;  %p126_p4 = scmp.lt.s32.totalorder %s15_s7, %s15_s7 }
   0x9   :  { %p122_p3 = scmp.ne.s32.totalorder %s15_s7, %s121_s15  ;;  %p127_p5 = scmp.lt.s32.totalorder %s121_s15, %s121_s15 }
   0xb   :  { %p128_p6 = por %p127_p5, %p126_p4 }
   0xd   :  { %p129_p7 = pnand %p128_p6, %p122_p3 }
   0xf   :  { %132 = shalt.err (!%p129_p7)
}
  0x10   :  { %17 = dma.hbm_to_vmem [thread:$0]  %s235_s0, 64, %s15_s7, [#allocation3]  }
  0x11   :  { %155 = dma.done.wait [#allocation3], 64  }
  0x12   :  { %156 = vsyncadd [#allocation3], 4294967232  ;;  %v22_v0 = vlaneseq  ;;  %vm28_vm7 = vcmask 1043456   ;;  %v21_v4 = vld [vmem:[#allocation2] sm:$0xf]  ;;  %s160_s0 = smov [#allocation5]  }
  0x13   :  { %s98_s18 = sshll.u32 %s160_s0, 4  ;;  %s99_s18 = int_to_ptr.vmem [resolvable:$true] %s98_s18 }
  0x14   :  { %v23_v1 = vand.u32 127, %v22_v0  ;;  %s133_s19 = scalar_lea.vmem %s99_s18, 64  ;;  %p138_p9 = scmp.lt.s32.totalorder %s99_s18, %s99_s18 }
  0x15   :  { %p134_p8 = scmp.ne.s32.totalorder %s99_s18, %s133_s19  ;;  %p139_p10 = scmp.lt.s32.totalorder %s133_s19, %s133_s19 }
  0x16   :  { %vm43_vm0 = vcmp.ge.s32.totalorder %v23_v1, 64  ;;  %vm44_vm1 = vcmp.lt.s32.totalorder %v23_v1, 96  ;;  %vm34_vm2 = vcmp.ge.s32.totalorder %v23_v1, 32  ;;  %vm25_vm3 = vcmp.lt.s32.totalorder %v23_v1, 32 }
  0x17   :  { %vm183_vm4 = vmand %vm43_vm0, %vm44_vm1  ;;  %vm35_vm5 = vcmp.lt.s32.totalorder %v23_v1, 64  ;;  %vm52_vm6 = vcmp.ge.s32.totalorder %v23_v1, 96  ;;  %v27_v5 = vsel %vm25_vm3, %v21_v4, 0.0  ;;  %p140_p11 = por %p139_p10, %p138_p9 }
  0x18   :  { %vm187_vm8 = vmand %vm34_vm2, %vm35_vm5  ;;  %v46_v6 = vsel %vm183_vm4, %v21_v4, 0.0  ;;  %v55_v8 = vsel %vm52_vm6, %v21_v4, 0.0  ;;  %v29_v9 = vsel %vm28_vm7, %v27_v5, 0.0 }
  0x19   :  { %v37_v7 = vsel %vm187_vm8, %v21_v4, 0.0  ;;  %v47_v10 = vsel %vm28_vm7, %v46_v6, 0.0  ;;  %30 = vadd.xlane.f32.xlu0 %v29_v9  ;;  %v56_v12 = vsel %vm28_vm7, %v55_v8, 0.0  ;;  %p141_p12 = pnand %p140_p11, %p134_p8 }
  0x1a   :  { %48 = vadd.xlane.f32.xlu1 %v47_v10  ;;  %v38_v11 = vsel %vm28_vm7, %v37_v7, 0.0 }
  0x1d   :  { %39 = vadd.xlane.f32.xlu0 %v38_v11 }
  0x1e   :  { %57 = vadd.xlane.f32.xlu1 %v56_v12 }
  0xa6   :  { %v31_v13 = vpop.xlane.xlu0 %30 }
  0xa7   :  { %v49_v14 = vpop.xlane.xlu1 %48  ;;  %v32_v15 = vmul.f32 0.03125, %v31_v13 }
  0xa8   :  { %v50_v21 = vmul.f32 0.03125, %v49_v14 }
  0xa9   :  { %v33_v20 = vsel %vm25_vm3, %v32_v15, 0.0 }
  0xaa   :  { %v40_v16 = vpop.xlane.xlu0 %39 }
  0xab   :  { %v58_v17 = vpop.xlane.xlu1 %57  ;;  %v41_v18 = vmul.f32 0.03125, %v40_v16 }
  0xac   :  { %v59_v19 = vmul.f32 0.03125, %v58_v17 }
  0xad   :  { %v42_v22 = vsel %vm187_vm8, %v41_v18, %v33_v20 }
  0xae   :  { %v51_v23 = vsel %vm183_vm4, %v50_v21, %v42_v22 }
  0xaf   :  { %v60_v24 = vsel %vm52_vm6, %v59_v19, %v51_v23 }
  0xb0   :  { %v61_v25 = vsub.f32 %v21_v4, %v60_v24 }
  0xb2   :  { %v62_v26 = vmul.f32 %v61_v25, %v61_v25 }
  0xb4   :  { %v69_v27 = vsel %vm187_vm8, %v62_v26, 0.0  ;;  %v63_v28 = vsel %vm25_vm3, %v62_v26, 0.0  ;;  %v81_v31 = vsel %vm52_vm6, %v62_v26, 0.0  ;;  %v75_v32 = vsel %vm183_vm4, %v62_v26, 0.0 }
  0xb5   :  { %v70_v29 = vsel %vm28_vm7, %v69_v27, 0.0  ;;  %v64_v30 = vsel %vm28_vm7, %v63_v28, 0.0  ;;  %v82_v33 = vsel %vm28_vm7, %v81_v31, 0.0  ;;  %v76_v34 = vsel %vm28_vm7, %v75_v32, 0.0 }
  0xb6   :  { %71 = vadd.xlane.f32.xlu1 %v70_v29  ;;  %65 = vadd.xlane.f32.xlu0 %v64_v30 }
  0xba   :  { %83 = vadd.xlane.f32.xlu1 %v82_v33  ;;  %77 = vadd.xlane.f32.xlu0 %v76_v34 }
 0x143   :  { %v72_v35 = vpop.xlane.xlu1 %71  ;;  %v66_v36 = vpop.xlane.xlu0 %65 }
 0x144   :  { %v67_v37 = vmul.f32 0.03125, %v66_v36  ;;  %v73_v38 = vmul.f32 0.03125, %v72_v35 }
 0x146   :  { %v68_v39 = vsel %vm25_vm3, %v67_v37, 0.0 }
 0x147   :  { %v84_v40 = vpop.xlane.xlu1 %83  ;;  %v78_v41 = vpop.xlane.xlu0 %77  ;;  %v74_v44 = vsel %vm187_vm8, %v73_v38, %v68_v39 }
 0x148   :  { %v85_v42 = vmul.f32 0.03125, %v84_v40  ;;  %v79_v43 = vmul.f32 0.03125, %v78_v41 }
 0x14a   :  { %v80_v45 = vsel %vm183_vm4, %v79_v43, %v74_v44 }
 0x14b   :  { %v86_v46 = vsel %vm52_vm6, %v85_v42, %v80_v45 }
 0x14c   :  { %v87_v47 = vadd.f32 1e-05, %v86_v46 }
 0x14e   :  { %109 = vrsqrt.f32 %v87_v47 }
 0x158   :  { %v110_v48 = vpop.eup %109 }
 0x159   :  { %v89_v49 = vmul.f32 0.5, %v110_v48 }
 0x15b   :  { %v90_v50 = vmul.f32 %v89_v49, %v61_v25 }
 0x15d   :  { %91 = vst [vmem:[#allocation5] sm:$0xf] %v90_v50 }
 0x15e   :  { %144 = shalt.err (!%p141_p12)
}
 0x15f   :  { %s145_s22 = scalar_lea.hbm %s236_s1, 64 }
 0x160   :  { %p146_p13 = scmp.ne.s32.totalorder %s236_s1, %s145_s22  ;;  %p149_p0 = scmp.lt.u32.totalorder %s145_s22, %s236_s1 }
 0x162   :  { %p151_p1 = pnand %p149_p0, %p146_p13 }
 0x164   :  { %154 = shalt.err (!%p151_p1)
}
 0x165   :  { %101 = dma.vmem_to_hbm [thread:$0]  %s99_s18, 64, %s236_s1, [#allocation4]  }
 0x166   :  { %157 = dma.done.wait [#allocation4], 64  }
 0x167   :  { %158 = vsyncadd [#allocation4], 4294967232 }
 0x168   :  { %105 = vsyncpa [#allocation3], 1 }
 0x169   :  { %106 = vsyncpa [#allocation4], 1 }

</bundles_post_ra>
